<compile_context>
chip_gen: v7x
topology: tpu7x:2x2x1
jax: 0.10.0
libtpu: 0.0.40
codegen_flags: <defaults>
</compile_context>

<pallas_src>
import functools

import jax
import jax.numpy as jnp
from jax import lax
from jax.experimental import pallas as pl
from jax.experimental.pallas import tpu as pltpu


def _attention_kernel(v_ref, w_ref, x_ref, o_ref, s_ref, *, seq_len, batch_tile):
    # v_ref: (H, 1)   w_ref: (H, H)   x_ref: (TB, H, S_pad)
    # o_ref: (TB, S_pad)              s_ref: (TB, S_pad) f32 VMEM scratch
    w = w_ref[...]                                   # resident (H, H)
    v = v_ref[...]                                   # resident (H, 1)

    # Unrolled static loop over the batch tile: one lane-dense MXU matmul per
    # batch element, tanh on VPU/EUP, then VPU broadcast-mul + sublane reduce.
    for b in range(batch_tile):
        h = jnp.tanh(jnp.dot(w, x_ref[b],
                             preferred_element_type=jnp.float32))    # (H, S_pad)
        s_ref[pl.ds(b, 1), :] = jnp.sum(v * h, axis=0, keepdims=True)  # (1, S_pad)

    s = s_ref[...]                                   # (TB, S_pad), f32

    # Mask padded seq lanes to -inf so they cannot inflate the softmax denom.
    lane = lax.broadcasted_iota(jnp.int32, s.shape, 1)
    s = jnp.where(lane < seq_len, s, -jnp.inf)

    # Numerically-stable softmax over the (lane) seq axis, in f32.
    m = jnp.max(s, axis=-1, keepdims=True)
    e = jnp.exp(s - m)
    denom = jnp.sum(e, axis=-1, keepdims=True)
    # Single dense (TB, S_pad) store.
    o_ref[...] = (e / denom).astype(o_ref.dtype)


def attention_forward(v, W, static_hidden):
    """v: (1,1,H), W: (1,H,H), static_hidden: (B,H,S) -> (B,1,S)."""
    B, H, S = static_hidden.shape

    S_pad = ((S + 127) // 128) * 128                 # lane-dense seq tile
    batch_tile = 8 if B <= 64 else 32                # sublane-dense batch tile
    B_pad = ((B + batch_tile - 1) // batch_tile) * batch_tile

    x_pad = jnp.pad(static_hidden,
                    ((0, B_pad - B), (0, 0), (0, S_pad - S)))
    v_col = v.reshape(H, 1)                          # column for VPU broadcast-mul
    w_mat = W.reshape(H, H)

    out_pad = pl.pallas_call(
        functools.partial(_attention_kernel, seq_len=S, batch_tile=batch_tile),
        out_shape=jax.ShapeDtypeStruct((B_pad, S_pad), static_hidden.dtype),
        grid_spec=pltpu.PrefetchScalarGridSpec(
            num_scalar_prefetch=0,
            grid=(B_pad // batch_tile,),             # parallel over batch tiles
            in_specs=[
                pl.BlockSpec((H, 1), lambda i: (0, 0)),              # v (resident)
                pl.BlockSpec((H, H), lambda i: (0, 0)),              # W (resident)
                pl.BlockSpec((batch_tile, H, S_pad), lambda i: (i, 0, 0)),  # x tile
            ],
            out_specs=pl.BlockSpec((batch_tile, S_pad), lambda i: (i, 0)),
            scratch_shapes=[pltpu.VMEM((batch_tile, S_pad), jnp.float32)],
        ),
        compiler_params=pltpu.CompilerParams(
            dimension_semantics=("parallel",),
            vmem_limit_bytes=32 << 20,               # safe on v5e/v6e/v7x
        ),
    )(v_col, w_mat, x_pad)

    return out_pad[:B, :S].reshape(B, 1, S)


def attention_reference(v, W, static_hidden):
    # Pure-JAX reference mirroring the PyTorch forward exactly.
    B, H, S = static_hidden.shape
    Wb = jnp.broadcast_to(W, (B, H, H))
    vb = jnp.broadcast_to(v, (B, 1, H))
    h = jnp.tanh(jnp.einsum('bij,bjk->bik', Wb, static_hidden))
    s = jnp.einsum('bij,bjk->bik', vb, h)            # (B, 1, S)
    return jax.nn.softmax(s, axis=2)


if __name__ == "__main__":
    key = jax.random.PRNGKey(0)
    B, H, S = 2, 32, 8

    k1, k2, k3 = jax.random.split(key, 3)
    # Deterministic (non-zero) parameter init; the module's __init__ uses zeros,
    # but zeros give a trivially-uniform softmax, so use small random values.
    v = jax.random.normal(k1, (1, 1, H), dtype=jnp.float32) * 0.1
    W = jax.random.normal(k2, (1, H, H), dtype=jnp.float32) * 0.1
    static_hidden = jax.random.normal(k3, (B, H, S), dtype=jnp.float32)

    out = attention_forward(v, W, static_hidden)
    out = jax.block_until_ready(out)

    ref = attention_reference(v, W, static_hidden)

    assert out.shape == (B, 1, S), out.shape
    assert jnp.allclose(out, ref, atol=1e-5, rtol=1e-5), (
        f"max abs err = {jnp.max(jnp.abs(out - ref))}")
    # Rows of a softmax must sum to one.
    assert jnp.allclose(jnp.sum(out, axis=2), 1.0, atol=1e-5)

    print("KERNEL_OK")
</pallas_src>

<mosaic_0001>
module attributes {stable_mosaic.version = 11 : i64} {
  func.func @_attention_kernel(%arg0: i32, %arg1: memref<32x1xf32, #tpu.memory_space<vmem>>, %arg2: memref<32x32xf32, #tpu.memory_space<vmem>>, %arg3: memref<8x32x128xf32, #tpu.memory_space<vmem>>, %arg4: memref<8x128xf32, #tpu.memory_space<vmem>>, %arg5: memref<8x128xf32, #tpu.memory_space<vmem>>) attributes {dimension_semantics = [#tpu.dimension_semantics<parallel>], iteration_bounds = array<i64: 1>, scalar_prefetch = 0 : i64, scratch_operands = 1 : i64, tpu.core_type = #tpu.core_type<tc>, window_params = [{pipeline_mode = #tpu.pipeline_mode<synchronous>, transform_indices = @transform_0, window_bounds = array<i64: 32, 1>}, {pipeline_mode = #tpu.pipeline_mode<synchronous>, transform_indices = @transform_1, window_bounds = array<i64: 32, 32>}, {transform_indices = @transform_2, window_bounds = array<i64: 8, 32, 128>}, {transform_indices = @transform_3, window_bounds = array<i64: 8, 128>}]} {
    %c0 = arith.constant 0 : index
    %c0_0 = arith.constant 0 : index
    %0 = vector.load %arg2[%c0, %c0_0] : memref<32x32xf32, #tpu.memory_space<vmem>>, vector<32x32xf32>
    %c0_1 = arith.constant 0 : index
    %c0_2 = arith.constant 0 : index
    %1 = vector.load %arg1[%c0_1, %c0_2] : memref<32x1xf32, #tpu.memory_space<vmem>>, vector<32x1xf32>
    %c0_3 = arith.constant 0 : index
    %c0_4 = arith.constant 0 : index
    %c0_5 = arith.constant 0 : index
    %2 = vector.load %arg3[%c0_3, %c0_4, %c0_5] : memref<8x32x128xf32, #tpu.memory_space<vmem>>, vector<1x32x128xf32>
    %3 = vector.shape_cast %2 : vector<1x32x128xf32> to vector<32x128xf32>
    %cst = arith.constant dense<0.000000e+00> : vector<32x128xf32>
    %4 = tpu.matmul %0, %3, %cst {dimension_numbers = #tpu.dot_dimension_numbers<[1], [0], [0], [1], [0, 0, 1, 1], [], []>} : vector<32x32xf32>, vector<32x128xf32>, vector<32x128xf32> -> vector<32x128xf32>
    %5 = math.tanh %4 : vector<32x128xf32>
    %6 = vector.broadcast %1 : vector<32x1xf32> to vector<32x128xf32>
    %7 = arith.mulf %6, %5 : vector<32x128xf32>
    %cst_6 = arith.constant dense<0.000000e+00> : vector<128xf32>
    %8 = vector.multi_reduction <add>, %7, %cst_6 [0] : vector<32x128xf32> to vector<128xf32>
    %9 = vector.shape_cast %8 : vector<128xf32> to vector<1x128xf32>
    %c0_7 = arith.constant 0 : index
    %c0_8 = arith.constant 0 : index
    %10 = vector.load %arg5[%c0_7, %c0_8] : memref<8x128xf32, #tpu.memory_space<vmem>>, vector<1x128xf32>
    tpu.vector_store %arg5[%c0_7, %c0_8], %9 {strides = array<i32>} : memref<8x128xf32, #tpu.memory_space<vmem>>, vector<1x128xf32>,
    %c1 = arith.constant 1 : index
    %c0_9 = arith.constant 0 : index
    %c0_10 = arith.constant 0 : index
    %11 = vector.load %arg3[%c1, %c0_9, %c0_10] : memref<8x32x128xf32, #tpu.memory_space<vmem>>, vector<1x32x128xf32>
    %12 = vector.shape_cast %11 : vector<1x32x128xf32> to vector<32x128xf32>
    %cst_11 = arith.constant dense<0.000000e+00> : vector<32x128xf32>
    %13 = tpu.matmul %0, %12, %cst_11 {dimension_numbers = #tpu.dot_dimension_numbers<[1], [0], [0], [1], [0, 0, 1, 1], [], []>} : vector<32x32xf32>, vector<32x128xf32>, vector<32x128xf32> -> vector<32x128xf32>
    %14 = math.tanh %13 : vector<32x128xf32>
    %15 = vector.broadcast %1 : vector<32x1xf32> to vector<32x128xf32>
    %16 = arith.mulf %15, %14 : vector<32x128xf32>
    %cst_12 = arith.constant dense<0.000000e+00> : vector<128xf32>
    %17 = vector.multi_reduction <add>, %16, %cst_12 [0] : vector<32x128xf32> to vector<128xf32>
    %18 = vector.shape_cast %17 : vector<128xf32> to vector<1x128xf32>
    %c1_13 = arith.constant 1 : index
    %c0_14 = arith.constant 0 : index
    %19 = vector.load %arg5[%c1_13, %c0_14] : memref<8x128xf32, #tpu.memory_space<vmem>>, vector<1x128xf32>
    tpu.vector_store %arg5[%c1_13, %c0_14], %18 {strides = array<i32>} : memref<8x128xf32, #tpu.memory_space<vmem>>, vector<1x128xf32>,
    %c2 = arith.constant 2 : index
    %c0_15 = arith.constant 0 : index
    %c0_16 = arith.constant 0 : index
    %20 = vector.load %arg3[%c2, %c0_15, %c0_16] : memref<8x32x128xf32, #tpu.memory_space<vmem>>, vector<1x32x128xf32>
    %21 = vector.shape_cast %20 : vector<1x32x128xf32> to vector<32x128xf32>
    %cst_17 = arith.constant dense<0.000000e+00> : vector<32x128xf32>
    %22 = tpu.matmul %0, %21, %cst_17 {dimension_numbers = #tpu.dot_dimension_numbers<[1], [0], [0], [1], [0, 0, 1, 1], [], []>} : vector<32x32xf32>, vector<32x128xf32>, vector<32x128xf32> -> vector<32x128xf32>
    %23 = math.tanh %22 : vector<32x128xf32>
    %24 = vector.broadcast %1 : vector<32x1xf32> to vector<32x128xf32>
    %25 = arith.mulf %24, %23 : vector<32x128xf32>
    %cst_18 = arith.constant dense<0.000000e+00> : vector<128xf32>
    %26 = vector.multi_reduction <add>, %25, %cst_18 [0] : vector<32x128xf32> to vector<128xf32>
    %27 = vector.shape_cast %26 : vector<128xf32> to vector<1x128xf32>
    %c2_19 = arith.constant 2 : index
    %c0_20 = arith.constant 0 : index
    %28 = vector.load %arg5[%c2_19, %c0_20] : memref<8x128xf32, #tpu.memory_space<vmem>>, vector<1x128xf32>
    tpu.vector_store %arg5[%c2_19, %c0_20], %27 {strides = array<i32>} : memref<8x128xf32, #tpu.memory_space<vmem>>, vector<1x128xf32>,
    %c3 = arith.constant 3 : index
    %c0_21 = arith.constant 0 : index
    %c0_22 = arith.constant 0 : index
    %29 = vector.load %arg3[%c3, %c0_21, %c0_22] : memref<8x32x128xf32, #tpu.memory_space<vmem>>, vector<1x32x128xf32>
    %30 = vector.shape_cast %29 : vector<1x32x128xf32> to vector<32x128xf32>
    %cst_23 = arith.constant dense<0.000000e+00> : vector<32x128xf32>
    %31 = tpu.matmul %0, %30, %cst_23 {dimension_numbers = #tpu.dot_dimension_numbers<[1], [0], [0], [1], [0, 0, 1, 1], [], []>} : vector<32x32xf32>, vector<32x128xf32>, vector<32x128xf32> -> vector<32x128xf32>
    %32 = math.tanh %31 : vector<32x128xf32>
    %33 = vector.broadcast %1 : vector<32x1xf32> to vector<32x128xf32>
    %34 = arith.mulf %33, %32 : vector<32x128xf32>
    %cst_24 = arith.constant dense<0.000000e+00> : vector<128xf32>
    %35 = vector.multi_reduction <add>, %34, %cst_24 [0] : vector<32x128xf32> to vector<128xf32>
    %36 = vector.shape_cast %35 : vector<128xf32> to vector<1x128xf32>
    %c3_25 = arith.constant 3 : index
    %c0_26 = arith.constant 0 : index
    %37 = vector.load %arg5[%c3_25, %c0_26] : memref<8x128xf32, #tpu.memory_space<vmem>>, vector<1x128xf32>
    tpu.vector_store %arg5[%c3_25, %c0_26], %36 {strides = array<i32>} : memref<8x128xf32, #tpu.memory_space<vmem>>, vector<1x128xf32>,
    %c4 = arith.constant 4 : index
    %c0_27 = arith.constant 0 : index
    %c0_28 = arith.constant 0 : index
    %38 = vector.load %arg3[%c4, %c0_27, %c0_28] : memref<8x32x128xf32, #tpu.memory_space<vmem>>, vector<1x32x128xf32>
    %39 = vector.shape_cast %38 : vector<1x32x128xf32> to vector<32x128xf32>
    %cst_29 = arith.constant dense<0.000000e+00> : vector<32x128xf32>
    %40 = tpu.matmul %0, %39, %cst_29 {dimension_numbers = #tpu.dot_dimension_numbers<[1], [0], [0], [1], [0, 0, 1, 1], [], []>} : vector<32x32xf32>, vector<32x128xf32>, vector<32x128xf32> -> vector<32x128xf32>
    %41 = math.tanh %40 : vector<32x128xf32>
    %42 = vector.broadcast %1 : vector<32x1xf32> to vector<32x128xf32>
    %43 = arith.mulf %42, %41 : vector<32x128xf32>
    %cst_30 = arith.constant dense<0.000000e+00> : vector<128xf32>
    %44 = vector.multi_reduction <add>, %43, %cst_30 [0] : vector<32x128xf32> to vector<128xf32>
    %45 = vector.shape_cast %44 : vector<128xf32> to vector<1x128xf32>
    %c4_31 = arith.constant 4 : index
    %c0_32 = arith.constant 0 : index
    %46 = vector.load %arg5[%c4_31, %c0_32] : memref<8x128xf32, #tpu.memory_space<vmem>>, vector<1x128xf32>
    tpu.vector_store %arg5[%c4_31, %c0_32], %45 {strides = array<i32>} : memref<8x128xf32, #tpu.memory_space<vmem>>, vector<1x128xf32>,
    %c5 = arith.constant 5 : index
    %c0_33 = arith.constant 0 : index
    %c0_34 = arith.constant 0 : index
    %47 = vector.load %arg3[%c5, %c0_33, %c0_34] : memref<8x32x128xf32, #tpu.memory_space<vmem>>, vector<1x32x128xf32>
    %48 = vector.shape_cast %47 : vector<1x32x128xf32> to vector<32x128xf32>
    %cst_35 = arith.constant dense<0.000000e+00> : vector<32x128xf32>
    %49 = tpu.matmul %0, %48, %cst_35 {dimension_numbers = #tpu.dot_dimension_numbers<[1], [0], [0], [1], [0, 0, 1, 1], [], []>} : vector<32x32xf32>, vector<32x128xf32>, vector<32x128xf32> -> vector<32x128xf32>
    %50 = math.tanh %49 : vector<32x128xf32>
    %51 = vector.broadcast %1 : vector<32x1xf32> to vector<32x128xf32>
    %52 = arith.mulf %51, %50 : vector<32x128xf32>
    %cst_36 = arith.constant dense<0.000000e+00> : vector<128xf32>
    %53 = vector.multi_reduction <add>, %52, %cst_36 [0] : vector<32x128xf32> to vector<128xf32>
    %54 = vector.shape_cast %53 : vector<128xf32> to vector<1x128xf32>
    %c5_37 = arith.constant 5 : index
    %c0_38 = arith.constant 0 : index
    %55 = vector.load %arg5[%c5_37, %c0_38] : memref<8x128xf32, #tpu.memory_space<vmem>>, vector<1x128xf32>
    tpu.vector_store %arg5[%c5_37, %c0_38], %54 {strides = array<i32>} : memref<8x128xf32, #tpu.memory_space<vmem>>, vector<1x128xf32>,
    %c6 = arith.constant 6 : index
    %c0_39 = arith.constant 0 : index
    %c0_40 = arith.constant 0 : index
    %56 = vector.load %arg3[%c6, %c0_39, %c0_40] : memref<8x32x128xf32, #tpu.memory_space<vmem>>, vector<1x32x128xf32>
    %57 = vector.shape_cast %56 : vector<1x32x128xf32> to vector<32x128xf32>
    %cst_41 = arith.constant dense<0.000000e+00> : vector<32x128xf32>
    %58 = tpu.matmul %0, %57, %cst_41 {dimension_numbers = #tpu.dot_dimension_numbers<[1], [0], [0], [1], [0, 0, 1, 1], [], []>} : vector<32x32xf32>, vector<32x128xf32>, vector<32x128xf32> -> vector<32x128xf32>
    %59 = math.tanh %58 : vector<32x128xf32>
    %60 = vector.broadcast %1 : vector<32x1xf32> to vector<32x128xf32>
    %61 = arith.mulf %60, %59 : vector<32x128xf32>
    %cst_42 = arith.constant dense<0.000000e+00> : vector<128xf32>
    %62 = vector.multi_reduction <add>, %61, %cst_42 [0] : vector<32x128xf32> to vector<128xf32>
    %63 = vector.shape_cast %62 : vector<128xf32> to vector<1x128xf32>
    %c6_43 = arith.constant 6 : index
    %c0_44 = arith.constant 0 : index
    %64 = vector.load %arg5[%c6_43, %c0_44] : memref<8x128xf32, #tpu.memory_space<vmem>>, vector<1x128xf32>
    tpu.vector_store %arg5[%c6_43, %c0_44], %63 {strides = array<i32>} : memref<8x128xf32, #tpu.memory_space<vmem>>, vector<1x128xf32>,
    %c7 = arith.constant 7 : index
    %c0_45 = arith.constant 0 : index
    %c0_46 = arith.constant 0 : index
    %65 = vector.load %arg3[%c7, %c0_45, %c0_46] : memref<8x32x128xf32, #tpu.memory_space<vmem>>, vector<1x32x128xf32>
    %66 = vector.shape_cast %65 : vector<1x32x128xf32> to vector<32x128xf32>
    %cst_47 = arith.constant dense<0.000000e+00> : vector<32x128xf32>
    %67 = tpu.matmul %0, %66, %cst_47 {dimension_numbers = #tpu.dot_dimension_numbers<[1], [0], [0], [1], [0, 0, 1, 1], [], []>} : vector<32x32xf32>, vector<32x128xf32>, vector<32x128xf32> -> vector<32x128xf32>
    %68 = math.tanh %67 : vector<32x128xf32>
    %69 = vector.broadcast %1 : vector<32x1xf32> to vector<32x128xf32>
    %70 = arith.mulf %69, %68 : vector<32x128xf32>
    %cst_48 = arith.constant dense<0.000000e+00> : vector<128xf32>
    %71 = vector.multi_reduction <add>, %70, %cst_48 [0] : vector<32x128xf32> to vector<128xf32>
    %72 = vector.shape_cast %71 : vector<128xf32> to vector<1x128xf32>
    %c7_49 = arith.constant 7 : index
    %c0_50 = arith.constant 0 : index
    %73 = vector.load %arg5[%c7_49, %c0_50] : memref<8x128xf32, #tpu.memory_space<vmem>>, vector<1x128xf32>
    tpu.vector_store %arg5[%c7_49, %c0_50], %72 {strides = array<i32>} : memref<8x128xf32, #tpu.memory_space<vmem>>, vector<1x128xf32>,
    %c0_51 = arith.constant 0 : index
    %c0_52 = arith.constant 0 : index
    %74 = vector.load %arg5[%c0_51, %c0_52] : memref<8x128xf32, #tpu.memory_space<vmem>>, vector<8x128xf32>
    %75 = tpu.iota {dimensions = array<i32: 1>} : vector<8x128xi32>
    %c8_i32 = arith.constant 8 : i32
    %76 = vector.broadcast %c8_i32 : i32 to vector<8x128xi32>
    %77 = arith.cmpi slt, %75, %76 : vector<8x128xi32>
    %cst_53 = arith.constant 0xFF800000 : f32
    %78 = vector.broadcast %cst_53 : f32 to vector<8x128xf32>
    %79 = arith.select %77, %74, %78 : vector<8x128xi1>, vector<8x128xf32>
    %cst_54 = arith.constant dense<0xFF800000> : vector<8xf32>
    %80 = vector.multi_reduction <maximumf>, %79, %cst_54 [1] : vector<8x128xf32> to vector<8xf32>
    %81 = vector.shape_cast %80 : vector<8xf32> to vector<8x1xf32>
    %82 = vector.broadcast %81 : vector<8x1xf32> to vector<8x128xf32>
    %83 = arith.subf %79, %82 : vector<8x128xf32>
    %84 = math.exp %83 : vector<8x128xf32>
    %cst_55 = arith.constant dense<0.000000e+00> : vector<8xf32>
    %85 = vector.multi_reduction <add>, %84, %cst_55 [1] : vector<8x128xf32> to vector<8xf32>
    %86 = vector.shape_cast %85 : vector<8xf32> to vector<8x1xf32>
    %87 = vector.broadcast %86 : vector<8x1xf32> to vector<8x128xf32>
    %88 = arith.divf %84, %87 : vector<8x128xf32>
    %c0_56 = arith.constant 0 : index
    %c0_57 = arith.constant 0 : index
    %89 = vector.load %arg4[%c0_56, %c0_57] : memref<8x128xf32, #tpu.memory_space<vmem>>, vector<8x128xf32>
    tpu.vector_store %arg4[%c0_56, %c0_57], %88 {strides = array<i32>} : memref<8x128xf32, #tpu.memory_space<vmem>>, vector<8x128xf32>,
    return
  }
  func.func @transform_0(%arg0: i32) -> (i32, i32) {
    %c0_i32 = arith.constant 0 : i32
    %c0_i32_0 = arith.constant 0 : i32
    %c0_i32_1 = arith.constant 0 : i32
    return %c0_i32, %c0_i32_0 : i32, i32
  }
  func.func @transform_1(%arg0: i32) -> (i32, i32) {
    %c0_i32 = arith.constant 0 : i32
    %c0_i32_0 = arith.constant 0 : i32
    %c0_i32_1 = arith.constant 0 : i32
    return %c0_i32, %c0_i32_0 : i32, i32
  }
  func.func @transform_2(%arg0: i32) -> (i32, i32, i32) {
    %c0_i32 = arith.constant 0 : i32
    %c0_i32_0 = arith.constant 0 : i32
    %c0_i32_1 = arith.constant 0 : i32
    return %arg0, %c0_i32, %c0_i32_0 : i32, i32, i32
  }
  func.func @transform_3(%arg0: i32) -> (i32, i32) {
    %c0_i32 = arith.constant 0 : i32
    %c0_i32_0 = arith.constant 0 : i32
    return %arg0, %c0_i32 : i32, i32
  }
}

</mosaic_0001>

<bundles_post_ra>
// kernel: tpu_custom_call.1
= control target key start
LH: loop header
LB: loop body
LE: loop exit
PB: predicated region body
PF: predicated region fallthrough
CT: control target
= control target key end

     0   :  { %8 = vsyncpa [#allocation4], 0  ;;  %s1543_s0 = inlined_call_operand.vmem [shape: f32[32,1], index: 0, kind: input, shape index: {}]   ;;  %s1544_s1 = inlined_call_operand.vmem [shape: f32[32,32], index: 1, kind: input, shape index: {}]   ;;  %s1545_s2 = inlined_call_operand.hbm [shape: f32[8,32,128], index: 2, kind: input, shape index: {}]   ;;  %s1546_s3 = inlined_call_operand.hbm [shape: f32[8,128], index: 3, kind: output, shape index: {}]  }
   0x1   :  { %9 = vsyncpa [#allocation5], 0  ;;  %s1358_s12 = smov [#allocation3]   ;;  %s1310_s16 = scalar_lea.hbm %s1545_s2, 4096 }
   0x2   :  { %s19_s13 = sshll.u32 %s1358_s12, 4  ;;  %p1311_p0 = scmp.ne.s32.totalorder %s1545_s2, %s1310_s16  ;;  %s20_s13 = int_to_ptr.vmem [resolvable:$true] %s19_s13 }
   0x3   :  { %p1314_p1 = scmp.lt.u32.totalorder %s1310_s16, %s1545_s2 }
   0x5   :  { %p1316_p2 = pnand %p1314_p1, %p1311_p0 }
   0x7   :  { %1319 = shalt.err (!%p1316_p2)
}
   0x8   :  { %s1320_s21 = scalar_lea.vmem %s20_s13, 4096  ;;  %p1325_p4 = scmp.lt.s32.totalorder %s20_s13, %s20_s13 }
   0x9   :  { %p1321_p3 = scmp.ne.s32.totalorder %s20_s13, %s1320_s21  ;;  %p1326_p5 = scmp.lt.s32.totalorder %s1320_s21, %s1320_s21 }
   0xb   :  { %p1327_p6 = por %p1326_p5, %p1325_p4 }
   0xd   :  { %p1328_p7 = pnand %p1327_p6, %p1321_p3 }
   0xf   :  { %1331 = shalt.err (!%p1328_p7)
}
  0x10   :  { %s1359_s22 = smov 128   ;;  %s1360_s23 = smov 8  }
  0x11   :  { %25 = dma.hbm_to_vmem [thread:$0]  %s1545_s2, 4096, %s20_s13, [#allocation4], %s1359_s22, %s1359_s22, %s1360_s23  }
  0x12   :  { %1354 = dma.done.wait [#allocation4], 4096  }
  0x13   :  { %1355 = vsyncadd [#allocation4], 4294963200  ;;  %v1361_v0 = vmov 0   ;;  %v37_v1 = vld [vmem:[#allocation3] sm:$0xff]  ;;  %v38_v2 = vld [vmem:[#allocation3 + $0x8] sm:$0xff]  ;;  %vm41_vm0 = vcmask 261120  }
  0x14   :  { %1240 = vset.pattern.permute.xlu0 %v1361_v0  ;;  %1241 = vset.pattern.permute.xlu1 %v1361_v0  ;;  %v178_v3 = vld [vmem:[#allocation3 + $0x20] sm:$0xff]  ;;  %v1171_v4 = vpack.c.bf16 %v38_v2, %v37_v1  ;;  %v179_v5 = vld [vmem:[#allocation3 + $0x28] sm:$0xff]  ;;  %v39_v6 = vld [vmem:[#allocation3 + $0x10] sm:$0xff] }
  0x15   :  { %v40_v7 = vld [vmem:[#allocation3 + $0x18] sm:$0xff]  ;;  %v1179_v8 = vpack.c.bf16 %v179_v5, %v178_v3  ;;  %v180_v10 = vld [vmem:[#allocation3 + $0x30] sm:$0xff]  ;;  %v286_v14 = vld [vmem:[#allocation3 + $0x40] sm:$0xff] }
  0x16   :  { %v1175_v9 = vpack.c.bf16 %v40_v7, %v39_v6  ;;  %v181_v11 = vld [vmem:[#allocation3 + $0x38] sm:$0xff]  ;;  %1172 = vmatprep.subr.bf16.mxu0 %v1171_v4  ;;  %v287_v15 = vld [vmem:[#allocation3 + $0x48] sm:$0xff]  ;;  %v394_v16 = vld [vmem:[#allocation3 + $0x60] sm:$0xff] }
  0x17   :  { %v1398_v12 = vld [vmem:[%s1544_s1] sm:$0xff]  ;;  %v1183_v13 = vpack.c.bf16 %v181_v11, %v180_v10  ;;  %1180 = vmatprep.subr.bf16.mxu1 %v1179_v8  ;;  %1174 = vmatpush3.bf16.msra.mxu0 %v1171_v4  ;;  %v395_v17 = vld [vmem:[#allocation3 + $0x68] sm:$0xff]  ;;  %v1187_v18 = vpack.c.bf16 %v287_v15, %v286_v14  ;;  %v288_v20 = vld [vmem:[#allocation3 + $0x50] sm:$0xff] }
  0x18   :  { %1067 = vmatprep.mubr.msk.f32.mxu0 %vm41_vm0, %v1398_v12  ;;  %1182 = vmatpush3.bf16.msra.mxu1 %v1179_v8  ;;  %v1195_v19 = vpack.c.bf16 %v395_v17, %v394_v16  ;;  %v289_v21 = vld [vmem:[#allocation3 + $0x58] sm:$0xff]  ;;  %v1407_v22 = vld [vmem:[%s1544_s1 + $0x8] sm:$0xff]  ;;  %v396_v23 = vld [vmem:[#allocation3 + $0x70] sm:$0xff] }
  0x19   :  { %1176 = vmatprep.subr.bf16.mxu0 %v1175_v9  ;;  %1184 = vmatprep.subr.bf16.mxu1 %v1183_v13  ;;  %v397_v24 = vld [vmem:[#allocation3 + $0x78] sm:$0xff]  ;;  %v1412_v25 = vld [vmem:[%s1544_s1 + $0x10] sm:$0xff]  ;;  %v1191_v26 = vpack.c.bf16 %v289_v21, %v288_v20  ;;  %v502_v28 = vld [vmem:[#allocation3 + $0x80] sm:$0xff] }
  0x1a   :  { %1081 = vmatprep.mubr.msk.f32.mxu1 %vm41_vm0, %v1398_v12  ;;  %v1199_v27 = vpack.c.bf16 %v397_v24, %v396_v23  ;;  %v503_v29 = vld [vmem:[#allocation3 + $0x88] sm:$0xff]  ;;  %v1421_v30 = vld [vmem:[%s1544_s1 + $0x18] sm:$0xff]  ;;  %v610_v31 = vld [vmem:[#allocation3 + $0xa0] sm:$0xff] }
  0x1b   :  { %1178 = vmatpush3.bf16.msra.mxu0 %v1175_v9  ;;  %v611_v32 = vld [vmem:[#allocation3 + $0xa8] sm:$0xff]  ;;  %v1203_v33 = vpack.c.bf16 %v503_v29, %v502_v28  ;;  %v504_v35 = vld [vmem:[#allocation3 + $0x90] sm:$0xff]  ;;  %v505_v36 = vld [vmem:[#allocation3 + $0x98] sm:$0xff] }
  0x1c   :  { %1186 = vmatpush3.bf16.msra.mxu1 %v1183_v13  ;;  %1188 = vmatprep.subr.bf16.mxu0 %v1187_v18  ;;  %v1211_v34 = vpack.c.bf16 %v611_v32, %v610_v31  ;;  %v612_v37 = vld [vmem:[#allocation3 + $0xb0] sm:$0xff]  ;;  %v613_v38 = vld [vmem:[#allocation3 + $0xb8] sm:$0xff]  ;;  %v1207_v39 = vpack.c.bf16 %v505_v36, %v504_v35  ;;  %v718_v41 = vld [vmem:[#allocation3 + $0xc0] sm:$0xff] }
  0x1d   :  { %1196 = vmatprep.subr.bf16.mxu1 %v1195_v19  ;;  %v1215_v40 = vpack.c.bf16 %v613_v38, %v612_v37  ;;  %v719_v42 = vld [vmem:[#allocation3 + $0xc8] sm:$0xff]  ;;  %v826_v43 = vld [vmem:[#allocation3 + $0xe0] sm:$0xff]  ;;  %v720_v47 = vld [vmem:[#allocation3 + $0xd0] sm:$0xff] }
  0x1e   :  { %1068 = vmatmul.mubr.msk.f32.vlgmr.msra.gmra.mrb[0].mxu0 %vm41_vm0, %v1407_v22  ;;  %v827_v44 = vld [vmem:[#allocation3 + $0xe8] sm:$0xff]  ;;  %v1219_v45 = vpack.c.bf16 %v719_v42, %v718_v41  ;;  %v721_v48 = vld [vmem:[#allocation3 + $0xd8] sm:$0xff]  ;;  %v828_v49 = vld [vmem:[#allocation3 + $0xf0] sm:$0xff] }
  0x1f   :  { %1082 = vmatmul.mubr.msk.f32.vlgmr.msra.gmra.mrb[0].mxu1 %vm41_vm0, %v1407_v22  ;;  %1190 = vmatpush3.bf16.msra.mxu0 %v1187_v18  ;;  %v1227_v46 = vpack.c.bf16 %v827_v44, %v826_v43  ;;  %v829_v50 = vld [vmem:[#allocation3 + $0xf8] sm:$0xff]  ;;  %v1223_v51 = vpack.c.bf16 %v721_v48, %v720_v47  ;;  %v35_v54 = vld [vmem:[%s1543_s0 + $0x10] sm:$0xff]  ;;  %v34_v55 = vld [vmem:[%s1543_s0 + $0x8] sm:$0xff] }
  0x20   :  { %1198 = vmatpush3.bf16.msra.mxu1 %v1195_v19  ;;  %1070 = vmatprep.mubr.msk.f32.mxu0 %vm41_vm0, %v1412_v25  ;;  %v1231_v52 = vpack.c.bf16 %v829_v50, %v828_v49  ;;  %v33_v53 = vld [vmem:[%s1543_s0] sm:$0xff]  ;;  %v36_v56 = vld [vmem:[%s1543_s0 + $0x18] sm:$0xff]  ;;  %s1362_s0 = smov [#allocation6]  }
  0x21   :  { %1084 = vmatprep.mubr.msk.f32.mxu1 %vm41_vm0, %v1412_v25  ;;  %1192 = vmatprep.subr.bf16.mxu0 %v1191_v26  ;;  %s954_s13 = sshll.u32 %s1362_s0, 4  ;;  %s955_s13 = int_to_ptr.vmem [resolvable:$true] %s954_s13 }
  0x22   :  { %1071 = vmatmul.mubr.msk.f32.gmra.mrb[2].mxu0 %vm41_vm0, %v1421_v30  ;;  %1200 = vmatprep.subr.bf16.mxu1 %v1199_v27  ;;  %s1332_s14 = scalar_lea.vmem %s955_s13, 128  ;;  %p1337_p9 = scmp.lt.s32.totalorder %s955_s13, %s955_s13 }
  0x23   :  { %1085 = vmatmul.mubr.msk.f32.gmra.mrb[2].mxu1 %vm41_vm0, %v1421_v30  ;;  %1194 = vmatpush3.bf16.msra.mxu0 %v1191_v26  ;;  %p1333_p8 = scmp.ne.s32.totalorder %s955_s13, %s1332_s14  ;;  %p1338_p10 = scmp.lt.s32.totalorder %s1332_s14, %s1332_s14 }
  0x24   :  { %1202 = vmatpush3.bf16.msra.mxu1 %v1199_v27  ;;  %1095 = vmatprep.mubr.msk.f32.mxu0 %vm41_vm0, %v1398_v12 }
  0x25   :  { %1109 = vmatprep.mubr.msk.f32.mxu1 %vm41_vm0, %v1398_v12  ;;  %1204 = vmatprep.subr.bf16.mxu0 %v1203_v33  ;;  %p1339_p11 = por %p1338_p10, %p1337_p9 }
  0x26   :  { %1096 = vmatmul.mubr.msk.f32.vlgmr.msra.gmra.mrb[4].mxu0 %vm41_vm0, %v1407_v22  ;;  %1212 = vmatprep.subr.bf16.mxu1 %v1211_v34 }
  0x27   :  { %1110 = vmatmul.mubr.msk.f32.vlgmr.msra.gmra.mrb[4].mxu1 %vm41_vm0, %v1407_v22  ;;  %1206 = vmatpush3.bf16.msra.mxu0 %v1203_v33  ;;  %p1340_p12 = pnand %p1339_p11, %p1333_p8 }
  0x28   :  { %1214 = vmatpush3.bf16.msra.mxu1 %v1211_v34  ;;  %1098 = vmatprep.mubr.msk.f32.mxu0 %vm41_vm0, %v1412_v25 }
  0x29   :  { %1112 = vmatprep.mubr.msk.f32.mxu1 %vm41_vm0, %v1412_v25  ;;  %1208 = vmatprep.subr.bf16.mxu0 %v1207_v39 }
  0x2a   :  { %1099 = vmatmul.mubr.msk.f32.gmra.mrb[6].mxu0 %vm41_vm0, %v1421_v30  ;;  %1216 = vmatprep.subr.bf16.mxu1 %v1215_v40 }
  0x2b   :  { %1113 = vmatmul.mubr.msk.f32.gmra.mrb[6].mxu1 %vm41_vm0, %v1421_v30  ;;  %1210 = vmatpush3.bf16.msra.mxu0 %v1207_v39 }
  0x2c   :  { %1218 = vmatpush3.bf16.msra.mxu1 %v1215_v40  ;;  %1123 = vmatprep.mubr.msk.f32.mxu0 %vm41_vm0, %v1398_v12 }
  0x2d   :  { %1137 = vmatprep.mubr.msk.f32.mxu1 %vm41_vm0, %v1398_v12  ;;  %1220 = vmatprep.subr.bf16.mxu0 %v1219_v45 }
  0x2e   :  { %1124 = vmatmul.mubr.msk.f32.vlgmr.msra.gmra.mrb[8].mxu0 %vm41_vm0, %v1407_v22  ;;  %1228 = vmatprep.subr.bf16.mxu1 %v1227_v46 }
  0x2f   :  { %1138 = vmatmul.mubr.msk.f32.vlgmr.msra.gmra.mrb[8].mxu1 %vm41_vm0, %v1407_v22  ;;  %1222 = vmatpush3.bf16.msra.mxu0 %v1219_v45 }
  0x30   :  { %1230 = vmatpush3.bf16.msra.mxu1 %v1227_v46  ;;  %1126 = vmatprep.mubr.msk.f32.mxu0 %vm41_vm0, %v1412_v25 }
  0x31   :  { %1140 = vmatprep.mubr.msk.f32.mxu1 %vm41_vm0, %v1412_v25  ;;  %1224 = vmatprep.subr.bf16.mxu0 %v1223_v51 }
  0x32   :  { %1127 = vmatmul.mubr.msk.f32.gmra.mrb[10].mxu0 %vm41_vm0, %v1421_v30  ;;  %1232 = vmatprep.subr.bf16.mxu1 %v1231_v52 }
  0x33   :  { %1141 = vmatmul.mubr.msk.f32.gmra.mrb[10].mxu1 %vm41_vm0, %v1421_v30  ;;  %1226 = vmatpush3.bf16.msra.mxu0 %v1223_v51 }
  0x34   :  { %1234 = vmatpush3.bf16.msra.mxu1 %v1231_v52  ;;  %1151 = vmatprep.mubr.msk.f32.mxu0 %vm41_vm0, %v1398_v12 }
  0x35   :  { %1165 = vmatprep.mubr.msk.f32.mxu1 %vm41_vm0, %v1398_v12  ;;  %145 = vperm.xlu0 %1240, %v33_v53  }
  0x36   :  { %1152 = vmatmul.mubr.msk.f32.vlgmr.msra.gmra.mrb[12].mxu0 %vm41_vm0, %v1407_v22  ;;  %155 = vperm.xlu1 %1241, %v35_v54  }
  0x37   :  { %1166 = vmatmul.mubr.msk.f32.vlgmr.msra.gmra.mrb[12].mxu1 %vm41_vm0, %v1407_v22  ;;  %1154 = vmatprep.mubr.msk.f32.mxu0 %vm41_vm0, %v1412_v25 }
  0x38   :  { %1168 = vmatprep.mubr.msk.f32.mxu1 %vm41_vm0, %v1412_v25 }
  0x39   :  { %150 = vperm.xlu0 %1240, %v34_v55  }
  0x3a   :  { %1155 = vmatmul.mubr.msk.f32.gmra.mrb[14].mxu0 %vm41_vm0, %v1421_v30  ;;  %160 = vperm.xlu1 %1241, %v36_v56  }
  0x3b   :  { %1169 = vmatmul.mubr.msk.f32.gmra.mrb[14].mxu1 %vm41_vm0, %v1421_v30 }
  0xb4   :  { %v1491_v61 = vpop.permute.xlu0 %145 }
  0xb5   :  { %v1495_v7 = vpop.permute.xlu1 %155 }
  0xb8   :  { %v1493_v3 = vpop.permute.xlu0 %150 }
  0xb9   :  { %v1501_v23 = vpop.permute.xlu1 %160 }
  0xf1   :  { %v1069_v57 = vpop.f32.mrb[0].mxu0 }
  0xf2   :  { %1242 = vtanh.f32 %v1069_v57  ;;  %v1083_v58 = vpop.f32.mrb[0].mxu1  ;;  %v120_v59 = vpop.f32.mrb[1].mxu0 }
  0xf3   :  { %1244 = vtanh.f32 %v1083_v58  ;;  %v248_v60 = vpop.f32.mrb[1].mxu1 }
  0xf4   :  { %1246 = vtanh.f32 %v120_v59 }
  0xf5   :  { %1248 = vtanh.f32 %v248_v60  ;;  %v1072_v62 = vpop.f32.mrb[2].mxu0 }
  0xf6   :  { %1250 = vtanh.f32 %v1072_v62  ;;  %v1086_v63 = vpop.f32.mrb[2].mxu1  ;;  %v130_v0 = vpop.f32.mrb[3].mxu0 }
  0xf7   :  { %1252 = vtanh.f32 %v1086_v63  ;;  %v258_v1 = vpop.f32.mrb[3].mxu1 }
  0xf8   :  { %1254 = vtanh.f32 %v130_v0 }
  0xf9   :  { %1256 = vtanh.f32 %v258_v1  ;;  %v1097_v2 = vpop.f32.mrb[4].mxu0 }
  0xfa   :  { %1258 = vtanh.f32 %v1097_v2  ;;  %v1111_v4 = vpop.f32.mrb[4].mxu1  ;;  %v356_v5 = vpop.f32.mrb[5].mxu0 }
  0xfb   :  { %1260 = vtanh.f32 %v1111_v4  ;;  %v464_v6 = vpop.f32.mrb[5].mxu1 }
  0xfc   :  { %v1243_v8 = vpop.eup %1242  ;;  %1262 = vtanh.f32 %v356_v5 }
  0xfd   :  { %v1245_v9 = vpop.eup %1244  ;;  %1264 = vtanh.f32 %v464_v6  ;;  %v164_v10 = vmul.f32 %v1243_v8, %v1493_v3  ;;  %v1100_v11 = vpop.f32.mrb[6].mxu0 }
  0xfe   :  { %v1247_v12 = vpop.eup %1246  ;;  %v272_v13 = vmul.f32 %v1245_v9, %v1493_v3  ;;  %1266 = vtanh.f32 %v1100_v11  ;;  %v1114_v14 = vpop.f32.mrb[6].mxu1 }
  0xff   :  { %v366_v15 = vpop.f32.mrb[7].mxu0  ;;  %v1249_v16 = vpop.eup %1248  ;;  %v163_v17 = vmul.f32 %v1247_v12, %v1491_v61  ;;  %1268 = vtanh.f32 %v1114_v14 }
 0x100   :  { %v474_v18 = vpop.f32.mrb[7].mxu1  ;;  %v1251_v19 = vpop.eup %1250  ;;  %v271_v20 = vmul.f32 %v1249_v16, %v1491_v61  ;;  %1270 = vtanh.f32 %v366_v15 }
 0x101   :  { %v1253_v21 = vpop.eup %1252  ;;  %v167_v22 = vadd.f32 %v164_v10, %v163_v17  ;;  %1272 = vtanh.f32 %v474_v18  ;;  %v1125_v24 = vpop.f32.mrb[8].mxu0  ;;  %v166_v36 = vmul.f32 %v1251_v19, %v1501_v23 }
 0x102   :  { %v1255_v25 = vpop.eup %1254  ;;  %v275_v26 = vadd.f32 %v272_v13, %v271_v20  ;;  %1274 = vtanh.f32 %v1125_v24  ;;  %v1139_v27 = vpop.f32.mrb[8].mxu1  ;;  %v274_v41 = vmul.f32 %v1253_v21, %v1501_v23 }
 0x103   :  { %v572_v28 = vpop.f32.mrb[9].mxu0  ;;  %v1257_v29 = vpop.eup %1256  ;;  %v165_v30 = vmul.f32 %v1255_v25, %v1495_v7  ;;  %1276 = vtanh.f32 %v1139_v27 }
 0x104   :  { %v680_v31 = vpop.f32.mrb[9].mxu1  ;;  %v1259_v32 = vpop.eup %1258  ;;  %v273_v33 = vmul.f32 %v1257_v29, %v1495_v7  ;;  %1278 = vtanh.f32 %v572_v28 }
 0x105   :  { %v1261_v34 = vpop.eup %1260  ;;  %v380_v35 = vmul.f32 %v1259_v32, %v1493_v3  ;;  %v168_v37 = vadd.f32 %v167_v22, %v165_v30  ;;  %1280 = vtanh.f32 %v680_v31  ;;  %v1128_v38 = vpop.f32.mrb[10].mxu0 }
 0x106   :  { %v1263_v39 = vpop.eup %1262  ;;  %v488_v40 = vmul.f32 %v1261_v34, %v1493_v3  ;;  %v276_v42 = vadd.f32 %v275_v26, %v273_v33  ;;  %1282 = vtanh.f32 %v1128_v38  ;;  %v1142_v43 = vpop.f32.mrb[10].mxu1 }
 0x107   :  { %v582_v44 = vpop.f32.mrb[11].mxu0  ;;  %v1265_v45 = vpop.eup %1264  ;;  %v379_v46 = vmul.f32 %v1263_v39, %v1491_v61  ;;  %v169_v47 = vadd.f32 %v168_v37, %v166_v36  ;;  %1284 = vtanh.f32 %v1142_v43 }
 0x108   :  { %v690_v48 = vpop.f32.mrb[11].mxu1  ;;  %v1267_v49 = vpop.eup %1266  ;;  %v487_v50 = vmul.f32 %v1265_v45, %v1491_v61  ;;  %v277_v51 = vadd.f32 %v276_v42, %v274_v41  ;;  %1286 = vtanh.f32 %v582_v44 }
 0x109   :  { %v1269_v52 = vpop.eup %1268  ;;  %v383_v53 = vadd.f32 %v380_v35, %v379_v46  ;;  %v170_v54 = vrot.slane %v169_v47, 4  ;;  %1288 = vtanh.f32 %v690_v48  ;;  %v1153_v55 = vpop.f32.mrb[12].mxu0  ;;  %v382_v6 = vmul.f32 %v1267_v49, %v1501_v23 }
 0x10a   :  { %v1271_v56 = vpop.eup %1270  ;;  %v491_v57 = vadd.f32 %v488_v40, %v487_v50  ;;  %v278_v58 = vrot.slane %v277_v51, 4  ;;  %1290 = vtanh.f32 %v1153_v55  ;;  %v1167_v59 = vpop.f32.mrb[12].mxu1  ;;  %v490_v16 = vmul.f32 %v1269_v52, %v1501_v23 }
 0x10b   :  { %v788_v60 = vpop.f32.mrb[13].mxu0  ;;  %v1273_v62 = vpop.eup %1272  ;;  %v381_v63 = vmul.f32 %v1271_v56, %v1495_v7  ;;  %v171_v0 = vadd.f32 %v170_v54, %v169_v47  ;;  %1292 = vtanh.f32 %v1167_v59 }
 0x10c   :  { %v896_v1 = vpop.f32.mrb[13].mxu1  ;;  %v1275_v2 = vpop.eup %1274  ;;  %v489_v4 = vmul.f32 %v1273_v62, %v1495_v7  ;;  %v279_v5 = vadd.f32 %v278_v58, %v277_v51  ;;  %1294 = vtanh.f32 %v788_v60 }
 0x10d   :  { %v1277_v8 = vpop.eup %1276  ;;  %v384_v9 = vadd.f32 %v383_v53, %v381_v63  ;;  %v172_v10 = vrot.slane %v171_v0, 2  ;;  %v596_v11 = vmul.f32 %v1275_v2, %v1493_v3  ;;  %1296 = vtanh.f32 %v896_v1  ;;  %v1156_v12 = vpop.f32.mrb[14].mxu0 }
 0x10e   :  { %v1279_v13 = vpop.eup %1278  ;;  %v492_v14 = vadd.f32 %v491_v57, %v489_v4  ;;  %v280_v15 = vrot.slane %v279_v5, 2  ;;  %v704_v17 = vmul.f32 %v1277_v8, %v1493_v3  ;;  %v1170_v18 = vpop.f32.mrb[14].mxu1  ;;  %1298 = vtanh.f32 %v1156_v12 }
 0x10f   :  { %v798_v19 = vpop.f32.mrb[15].mxu0  ;;  %v1281_v20 = vpop.eup %1280  ;;  %v173_v21 = vadd.f32 %v172_v10, %v171_v0  ;;  %v385_v22 = vadd.f32 %v384_v9, %v382_v6  ;;  %v595_v24 = vmul.f32 %v1279_v13, %v1491_v61 }
 0x110   :  { %v906_v25 = vpop.f32.mrb[15].mxu1  ;;  %v1283_v26 = vpop.eup %1282  ;;  %v281_v27 = vadd.f32 %v280_v15, %v279_v5  ;;  %v493_v28 = vadd.f32 %v492_v14, %v490_v16  ;;  %v703_v29 = vmul.f32 %v1281_v20, %v1491_v61  ;;  %1300 = vtanh.f32 %v798_v19 }
 0x111   :  { %v1285_v30 = vpop.eup %1284  ;;  %v174_v31 = vrot.slane %v173_v21, 1  ;;  %v386_v32 = vrot.slane %v385_v22, 4  ;;  %v599_v33 = vadd.f32 %v596_v11, %v595_v24  ;;  %1302 = vtanh.f32 %v1170_v18 }
 0x112   :  { %v1287_v34 = vpop.eup %1286  ;;  %v282_v35 = vrot.slane %v281_v27, 1  ;;  %v494_v36 = vrot.slane %v493_v28, 4  ;;  %v707_v37 = vadd.f32 %v704_v17, %v703_v29  ;;  %1304 = vtanh.f32 %v906_v25 }
 0x113   :  { %v1289_v38 = vpop.eup %1288  ;;  %v175_v39 = vadd.f32 %v174_v31, %v173_v21  ;;  %v387_v40 = vadd.f32 %v386_v32, %v385_v22  ;;  %v597_v41 = vmul.f32 %v1287_v34, %v1495_v7  ;;  %v598_v48 = vmul.f32 %v1283_v26, %v1501_v23 }
 0x114   :  { %v1291_v42 = vpop.eup %1290  ;;  %v283_v43 = vadd.f32 %v282_v35, %v281_v27  ;;  %v495_v44 = vadd.f32 %v494_v36, %v493_v28  ;;  %v705_v45 = vmul.f32 %v1289_v38, %v1495_v7  ;;  %v706_v53 = vmul.f32 %v1285_v30, %v1501_v23 }
 0x115   :  { %v1293_v46 = vpop.eup %1292  ;;  %176 = vst [vmem:[#allocation2] sm:$0x1] %v175_v39  ;;  %v388_v47 = vrot.slane %v387_v40, 2  ;;  %v600_v49 = vadd.f32 %v599_v33, %v597_v41  ;;  %v812_v50 = vmul.f32 %v1291_v42, %v1493_v3 }
 0x116   :  { %v1295_v51 = vpop.eup %1294  ;;  %284 = vst [vmem:[#allocation2 + $0x1] sm:$0x1] %v283_v43  ;;  %v496_v52 = vrot.slane %v495_v44, 2  ;;  %v708_v54 = vadd.f32 %v707_v37, %v705_v45  ;;  %v920_v55 = vmul.f32 %v1293_v46, %v1493_v3 }
 0x117   :  { %v1297_v56 = vpop.eup %1296  ;;  %v389_v57 = vadd.f32 %v388_v47, %v387_v40  ;;  %v601_v58 = vadd.f32 %v600_v49, %v598_v48  ;;  %v811_v59 = vmul.f32 %v1295_v51, %v1491_v61 }
 0x118   :  { %v497_v60 = vadd.f32 %v496_v52, %v495_v44  ;;  %v709_v62 = vadd.f32 %v708_v54, %v706_v53  ;;  %v919_v63 = vmul.f32 %v1297_v56, %v1491_v61  ;;  %v1299_v0 = vpop.eup %1298 }
 0x119   :  { %v390_v1 = vrot.slane %v389_v57, 1  ;;  %v602_v2 = vrot.slane %v601_v58, 4  ;;  %v815_v4 = vadd.f32 %v812_v50, %v811_v59  ;;  %v814_v61 = vmul.f32 %v1299_v0, %v1501_v23 }
 0x11a   :  { %v1301_v5 = vpop.eup %1300  ;;  %v498_v6 = vrot.slane %v497_v60, 1  ;;  %v710_v8 = vrot.slane %v709_v62, 4  ;;  %v923_v9 = vadd.f32 %v920_v55, %v919_v63 }
 0x11b   :  { %v391_v10 = vadd.f32 %v390_v1, %v389_v57  ;;  %v603_v11 = vadd.f32 %v602_v2, %v601_v58  ;;  %v813_v3 = vmul.f32 %v1301_v5, %v1495_v7  ;;  %v1303_v12 = vpop.eup %1302 }
 0x11c   :  { %v499_v13 = vadd.f32 %v498_v6, %v497_v60  ;;  %v711_v14 = vadd.f32 %v710_v8, %v709_v62  ;;  %v1305_v15 = vpop.eup %1304  ;;  %v922_v24 = vmul.f32 %v1303_v12, %v1501_v23  ;;  %v934_v23 = vlaneseq }
 0x11d   :  { %392 = vst [vmem:[#allocation2 + $0x2] sm:$0x1] %v391_v10  ;;  %v604_v16 = vrot.slane %v603_v11, 2  ;;  %v816_v17 = vadd.f32 %v815_v4, %v813_v3  ;;  %v921_v19 = vmul.f32 %v1305_v15, %v1495_v7 }
 0x11e   :  { %500 = vst [vmem:[#allocation2 + $0x3] sm:$0x1] %v499_v13  ;;  %v712_v18 = vrot.slane %v711_v14, 2  ;;  %v935_v42 = vand.u32 127, %v934_v23 }
 0x11f   :  { %v605_v20 = vadd.f32 %v604_v16, %v603_v11  ;;  %v817_v21 = vadd.f32 %v816_v17, %v814_v61  ;;  %v924_v25 = vadd.f32 %v923_v9, %v921_v19 }
 0x120   :  { %v713_v22 = vadd.f32 %v712_v18, %v711_v14  ;;  %vm936_vm1 = vcmp.lt.s32.totalorder %v935_v42, 8 }
 0x121   :  { %v606_v26 = vrot.slane %v605_v20, 1  ;;  %v818_v27 = vrot.slane %v817_v21, 4  ;;  %v925_v29 = vadd.f32 %v924_v25, %v922_v24 }
 0x122   :  { %v714_v28 = vrot.slane %v713_v22, 1 }
 0x123   :  { %v607_v30 = vadd.f32 %v606_v26, %v605_v20  ;;  %v819_v31 = vadd.f32 %v818_v27, %v817_v21  ;;  %v926_v33 = vrot.slane %v925_v29, 4 }
 0x124   :  { %v715_v32 = vadd.f32 %v714_v28, %v713_v22 }
 0x125   :  { %608 = vst [vmem:[#allocation2 + $0x4] sm:$0x1] %v607_v30  ;;  %v820_v34 = vrot.slane %v819_v31, 2  ;;  %v927_v35 = vadd.f32 %v926_v33, %v925_v29 }
 0x126   :  { %716 = vst [vmem:[#allocation2 + $0x5] sm:$0x1] %v715_v32 }
 0x127   :  { %v821_v36 = vadd.f32 %v820_v34, %v819_v31  ;;  %v928_v7 = vrot.slane %v927_v35, 2 }
 0x129   :  { %v822_v37 = vrot.slane %v821_v36, 1  ;;  %v929_v38 = vadd.f32 %v928_v7, %v927_v35 }
 0x12b   :  { %v823_v39 = vadd.f32 %v822_v37, %v821_v36  ;;  %v930_v40 = vrot.slane %v929_v38, 1 }
 0x12d   :  { %824 = vst [vmem:[#allocation2 + $0x6] sm:$0x1] %v823_v39  ;;  %v931_v41 = vadd.f32 %v930_v40, %v929_v38 }
 0x12f   :  { %932 = vst [vmem:[#allocation2 + $0x7] sm:$0x1] %v931_v41 }
 0x136   :  { %v933_v43 = vld [vmem:[#allocation2] sm:$0xff] }
 0x137   :  { %v937_v44 = vsel %vm936_vm1, %v933_v43, -inf }
 0x138   :  { %938 = vmax.xlane.f32.xlu0 %v937_v44 }
 0x1c5   :  { %v939_v45 = vpop.xlane.xlu0 %938 }
 0x1c6   :  { %v940_v46 = vsub.f32 %v937_v44, %v939_v45 }
 0x1c8   :  { %v941_v47 = vmul.f32 1.442695, %v940_v46 }
 0x1ca   :  { %1306 = vpow2.f32 %v941_v47 }
 0x1d4   :  { %v1307_v48 = vpop.eup %1306 }
 0x1d5   :  { %943 = vadd.xlane.f32.xlu1 %v1307_v48 }
 0x262   :  { %v944_v49 = vpop.xlane.xlu1 %943 }
 0x263   :  { %1308 = vrcp.f32 %v944_v49 }
 0x26d   :  { %v1309_v50 = vpop.eup %1308 }
 0x26e   :  { %v946_v51 = vmul.f32 %v1309_v50, %v1307_v48 }
 0x270   :  { %947 = vst [vmem:[#allocation6] sm:$0xff] %v946_v51 }
 0x271   :  { %1343 = shalt.err (!%p1340_p12)
}
 0x272   :  { %s1344_s17 = scalar_lea.hbm %s1546_s3, 128 }
 0x273   :  { %p1345_p13 = scmp.ne.s32.totalorder %s1546_s3, %s1344_s17  ;;  %p1348_p0 = scmp.lt.u32.totalorder %s1344_s17, %s1546_s3 }
 0x275   :  { %p1350_p1 = pnand %p1348_p0, %p1345_p13 }
 0x277   :  { %1353 = shalt.err (!%p1350_p1)
}
 0x278   :  { %957 = dma.vmem_to_hbm [thread:$0]  %s955_s13, 128, %s1546_s3, [#allocation5]  }
 0x279   :  { %1356 = dma.done.wait [#allocation5], 128  }
 0x27a   :  { %1357 = vsyncadd [#allocation5], 4294967168 }
 0x27b   :  { %961 = vsyncpa [#allocation4], 1 }
 0x27c   :  { %962 = vsyncpa [#allocation5], 1 }

</bundles_post_ra>
